<compile_context>
chip_gen: v5e
topology: v5e:2x2
jax: 0.10.0
libtpu: 0.0.40
codegen_flags: <defaults>
</compile_context>

<pallas_src>
import functools

import jax
import jax.numpy as jnp
from jax.experimental import pallas as pl
from jax.experimental.pallas import tpu as pltpu

LANES = 128


def _round_up(a, b):
    return ((a + b - 1) // b) * b


def _sim_cls_loss_kernel(x_ref, y_ref, loss_ref, acc_ref, *, pos_weight, inv_batch):
    step = pl.program_id(0)

    @pl.when(step == 0)
    def _init():
        acc_ref[0, 0] = jnp.float32(0.0)

    x = x_ref[...]                       # (tile, 128) f32 logits
    y = y_ref[...].astype(jnp.float32)   # (tile, 128) labels in {-1., 0., 1.}

    # numerically stable BCE-with-logits, elementwise:
    #   max(x, 0) - x*y + log(1 + exp(-|x|))
    full = jnp.maximum(x, 0.0) - x * y + jnp.log1p(jnp.exp(-jnp.abs(x)))

    # weight: pos_weight where label == 1, 1.0 where label == 0, 0 otherwise
    w = jnp.where(y == 1.0, jnp.float32(pos_weight),
                  jnp.where(y == 0.0, jnp.float32(1.0), jnp.float32(0.0)))

    acc_ref[0, 0] += jnp.sum(w * full)

    @pl.when(step == pl.num_programs(0) - 1)
    def _finish():
        loss_ref[0, 0] = acc_ref[0, 0] * jnp.float32(inv_batch)


def sim_classification_loss(output, labels, pos_weight=1.0, tile_rows=4096):
    """output, labels: (N, 1) float32. Returns scalar float32 loss.

    tile_rows: rows of 128 lanes per grid step (multiple of 16). The default
    4096 fits all generations; on v6e it can be raised (e.g. 8192) for slightly
    better overhead amortization.
    """
    n = output.shape[0]

    x = output.reshape(-1).astype(jnp.float32)
    y = labels.reshape(-1).astype(jnp.float32)

    # Lane-dense slab: rows of 128 lanes; rows padded to a multiple of the tile
    # (tile itself a multiple of 16 so bf16 sublane packing is clean).
    rows = pl.cdiv(n, LANES)
    tile = min(tile_rows, _round_up(rows, 16))
    rows_padded = _round_up(rows, tile)
    total = rows_padded * LANES
    pad = total - n

    x = jnp.pad(x, (0, pad), constant_values=0.0).reshape(rows_padded, LANES)
    # padded labels = -1.0 -> weight 0 -> no contribution; bf16 halves label HBM traffic
    y = jnp.pad(y, (0, pad), constant_values=-1.0).astype(jnp.bfloat16)
    y = y.reshape(rows_padded, LANES)

    num_tiles = rows_padded // tile

    kernel = functools.partial(
        _sim_cls_loss_kernel,
        pos_weight=float(pos_weight),
        inv_batch=1.0 / float(n),
    )

    loss = pl.pallas_call(
        kernel,
        out_shape=jax.ShapeDtypeStruct((1, 1), jnp.float32),
        grid_spec=pltpu.PrefetchScalarGridSpec(
            num_scalar_prefetch=0,
            grid=(num_tiles,),
            in_specs=[
                pl.BlockSpec((tile, LANES), lambda i: (i, 0)),
                pl.BlockSpec((tile, LANES), lambda i: (i, 0)),
            ],
            out_specs=pl.BlockSpec(memory_space=pltpu.MemorySpace.SMEM),
            scratch_shapes=[pltpu.SMEM((1, 1), jnp.float32)],
        ),
        compiler_params=pltpu.CompilerParams(
            dimension_semantics=("arbitrary",),  # reduction axis
        ),
    )(x, y)
    return loss[0, 0]


def _reference(output, labels, pos_weight):
    x = output.astype(jnp.float32)
    y = labels.astype(jnp.float32)
    full = jnp.maximum(x, 0.0) - x * y + jnp.log1p(jnp.exp(-jnp.abs(x)))
    w = jnp.where(y == 1.0, pos_weight, jnp.where(y == 0.0, 1.0, 0.0))
    return jnp.sum(w * full) / x.shape[0]


if __name__ == "__main__":
    key = jax.random.PRNGKey(0)
    k1, k2 = jax.random.split(key)

    N = 8
    pos_weight = 2.0

    # deterministic synthetic logits and binary labels, shape (N, 1)
    output = jax.random.normal(k1, (N, 1), dtype=jnp.float32)
    labels = jax.random.bernoulli(k2, 0.5, (N, 1)).astype(jnp.float32)

    loss = sim_classification_loss(output, labels, pos_weight=pos_weight)
    loss = jax.block_until_ready(loss)

    ref = _reference(output, labels, pos_weight)
    assert jnp.allclose(loss, ref, rtol=1e-5, atol=1e-6), (loss, ref)

    print("KERNEL_OK")
</pallas_src>

<mosaic_0001>
module attributes {stable_mosaic.version = 11 : i64} {
  func.func @_sim_cls_loss_kernel(%arg0: i32, %arg1: memref<16x128xf32, #tpu.memory_space<vmem>>, %arg2: memref<16x128xbf16, #tpu.memory_space<vmem>>, %arg3: memref<1x1xf32, #tpu.memory_space<smem>>, %arg4: memref<1x1xf32, #tpu.memory_space<smem>>) attributes {dimension_semantics = [#tpu.dimension_semantics<arbitrary>], iteration_bounds = array<i64: 1>, scalar_prefetch = 0 : i64, scratch_operands = 1 : i64, tpu.core_type = #tpu.core_type<tc>, window_params = [{transform_indices = @transform_0, window_bounds = array<i64: 16, 128>}, {transform_indices = @transform_1, window_bounds = array<i64: 16, 128>}, {transform_indices = @transform_2, window_bounds = array<i64: 1, 1>}]} {
    %c0_i32 = arith.constant 0 : i32
    %0 = arith.cmpi eq, %arg0, %c0_i32 : i32
    %1 = arith.extui %0 : i1 to i32
    %c0_i32_0 = arith.constant 0 : i32
    %2 = arith.cmpi ne, %1, %c0_i32_0 : i32
    scf.if %2 {
      %cst_17 = arith.constant 0.000000e+00 : f32
      %c0_18 = arith.constant 0 : index
      %c0_19 = arith.constant 0 : index
      %36 = memref.load %arg4[%c0_18, %c0_19] : memref<1x1xf32, #tpu.memory_space<smem>>
      memref.store %cst_17, %arg4[%c0_18, %c0_19] : memref<1x1xf32, #tpu.memory_space<smem>>
    } else {
    }
    %c0 = arith.constant 0 : index
    %c0_1 = arith.constant 0 : index
    %3 = vector.load %arg1[%c0, %c0_1] : memref<16x128xf32, #tpu.memory_space<vmem>>, vector<16x128xf32>
    %c0_2 = arith.constant 0 : index
    %c0_3 = arith.constant 0 : index
    %4 = vector.load %arg2[%c0_2, %c0_3] : memref<16x128xbf16, #tpu.memory_space<vmem>>, vector<16x128xbf16>
    %5 = arith.extf %4 : vector<16x128xbf16> to vector<16x128xf32>
    %cst = arith.constant 0.000000e+00 : f32
    %6 = vector.broadcast %cst : f32 to vector<16x128xf32>
    %7 = arith.maximumf %3, %6 : vector<16x128xf32>
    %8 = arith.mulf %3, %5 : vector<16x128xf32>
    %9 = arith.subf %7, %8 : vector<16x128xf32>
    %10 = math.absf %3 : vector<16x128xf32>
    %cst_4 = arith.constant 0.000000e+00 : f32
    %11 = vector.broadcast %cst_4 : f32 to vector<16x128xf32>
    %12 = arith.subf %11, %10 : vector<16x128xf32>
    %13 = math.exp %12 : vector<16x128xf32>
    %14 = math.log1p %13 : vector<16x128xf32>
    %15 = arith.addf %9, %14 : vector<16x128xf32>
    %cst_5 = arith.constant 1.000000e+00 : f32
    %16 = vector.broadcast %cst_5 : f32 to vector<16x128xf32>
    %17 = arith.cmpf oeq, %5, %16 : vector<16x128xf32>
    %cst_6 = arith.constant 0.000000e+00 : f32
    %18 = vector.broadcast %cst_6 : f32 to vector<16x128xf32>
    %19 = arith.cmpf oeq, %5, %18 : vector<16x128xf32>
    %cst_7 = arith.constant 1.000000e+00 : f32
    %cst_8 = arith.constant 0.000000e+00 : f32
    %20 = vector.broadcast %cst_7 : f32 to vector<16x128xf32>
    %21 = vector.broadcast %cst_8 : f32 to vector<16x128xf32>
    %22 = arith.select %19, %20, %21 : vector<16x128xi1>, vector<16x128xf32>
    %cst_9 = arith.constant 2.000000e+00 : f32
    %23 = vector.broadcast %cst_9 : f32 to vector<16x128xf32>
    %24 = arith.select %17, %23, %22 : vector<16x128xi1>, vector<16x128xf32>
    %c0_10 = arith.constant 0 : index
    %c0_11 = arith.constant 0 : index
    %25 = memref.load %arg4[%c0_10, %c0_11] : memref<1x1xf32, #tpu.memory_space<smem>>
    %26 = arith.mulf %24, %15 : vector<16x128xf32>
    %27 = vector.shape_cast %26 : vector<16x128xf32> to vector<1x16x128xf32>
    %cst_12 = arith.constant dense<0.000000e+00> : vector<1xf32>
    %28 = vector.multi_reduction <add>, %27, %cst_12 [1, 2] : vector<1x16x128xf32> to vector<1xf32>
    %29 = vector.shape_cast %28 : vector<1xf32> to vector<1x1x1xf32>
    %30 = vector.extract %29[0, 0, 0] : f32 from vector<1x1x1xf32>
    %31 = arith.addf %25, %30 : f32
    %c0_13 = arith.constant 0 : index
    %c0_14 = arith.constant 0 : index
    %32 = memref.load %arg4[%c0_13, %c0_14] : memref<1x1xf32, #tpu.memory_space<smem>>
    memref.store %31, %arg4[%c0_13, %c0_14] : memref<1x1xf32, #tpu.memory_space<smem>>
    %c0_i32_15 = arith.constant 0 : i32
    %33 = arith.cmpi eq, %arg0, %c0_i32_15 : i32
    %34 = arith.extui %33 : i1 to i32
    %c0_i32_16 = arith.constant 0 : i32
    %35 = arith.cmpi ne, %34, %c0_i32_16 : i32
    scf.if %35 {
      %c0_17 = arith.constant 0 : index
      %c0_18 = arith.constant 0 : index
      %36 = memref.load %arg4[%c0_17, %c0_18] : memref<1x1xf32, #tpu.memory_space<smem>>
      %cst_19 = arith.constant 1.250000e-01 : f32
      %37 = arith.mulf %36, %cst_19 : f32
      %c0_20 = arith.constant 0 : index
      %c0_21 = arith.constant 0 : index
      %38 = memref.load %arg3[%c0_20, %c0_21] : memref<1x1xf32, #tpu.memory_space<smem>>
      memref.store %37, %arg3[%c0_20, %c0_21] : memref<1x1xf32, #tpu.memory_space<smem>>
    } else {
    }
    return
  }
  func.func @transform_0(%arg0: i32) -> (i32, i32) {
    %c0_i32 = arith.constant 0 : i32
    %c0_i32_0 = arith.constant 0 : i32
    return %arg0, %c0_i32 : i32, i32
  }
  func.func @transform_1(%arg0: i32) -> (i32, i32) {
    %c0_i32 = arith.constant 0 : i32
    %c0_i32_0 = arith.constant 0 : i32
    return %arg0, %c0_i32 : i32, i32
  }
  func.func @transform_2(%arg0: i32) -> (i32, i32) {
    %c0_i32 = arith.constant 0 : i32
    %c0_i32_0 = arith.constant 0 : i32
    %c0_i32_1 = arith.constant 0 : i32
    return %c0_i32, %c0_i32_0 : i32, i32
  }
}

</mosaic_0001>

<bundles_post_ra>
// kernel: tpu_custom_call.1
= control target key start
LH: loop header
LB: loop body
LE: loop exit
PB: predicated region body
PF: predicated region fallthrough
CT: control target
= control target key end

     0   :  { %7 = vsyncpa [#allocation4], 0  ;;  %s259_s0 = inlined_call_operand.hbm [shape: f32[16,128], index: 0, kind: input, shape index: {}]   ;;  %s260_s1 = inlined_call_operand.hbm [shape: bf16[16,128], index: 1, kind: input, shape index: {}]   ;;  %s261_s2 = inlined_call_operand.hbm [shape: f32[1,1], index: 2, kind: output, shape index: {}]  }
   0x1   :  { %8 = vsyncpa [#allocation7], 0 }
   0x2   :  { %9 = vsyncpa [#allocation5], 0  ;;  %s14_s11 = sshll.u32 %s259_s0, 4  ;;  %s226_s12 = smov [#allocation3]   ;;  %s15_s11 = int_to_ptr.hbm [resolvable:$true] %s14_s11 }
   0x3   :  { %s16_s13 = sshll.u32 %s226_s12, 4  ;;  %s27_s16 = sshll.u32 %s260_s1, 4  ;;  %s17_s13 = int_to_ptr.vmem [resolvable:$true] %s16_s13  ;;  %s28_s16 = int_to_ptr.hbm [resolvable:$true] %s27_s16 }
   0x4   :  { %s227_s17 = smov 128   ;;  %s228_s18 = smov 8  }
   0x5   :  { %22 = dma.hbm_to_vmem [thread:$0]  %s15_s11, 256, %s17_s13, [#allocation4], %s227_s17, %s227_s17, %s228_s18  }
   0x6   :  { %s229_s19 = smov [#allocation6]   ;;  %s230_s21 = smov 64  }
   0x7   :  { %s29_s20 = sshll.u32 %s229_s19, 4  ;;  %s231_s22 = smov 4   ;;  %s30_s20 = int_to_ptr.vmem [resolvable:$true] %s29_s20 }
   0x8   :  { %35 = dma.hbm_to_vmem [thread:$0]  %s28_s16, 128, %s30_s20, [#allocation7], %s230_s21, %s230_s21, %s231_s22  }
   0x9   :  { %220 = dma.done.wait [#allocation4], 256  }
   0xa   :  { %221 = vsyncadd [#allocation4], 4294967040 }
   0xb   :  { %222 = dma.done.wait [#allocation7], 128  }
   0xc   :  { %223 = vsyncadd [#allocation7], 4294967168  ;;  %v50_v0 = vld [vmem:[#allocation3] sm:$0xff]  ;;  %v51_v1 = vld [vmem:[#allocation3 + $0x8] sm:$0xff]  ;;  %v232_v29 = vmov 0.0   ;;  %s126_s23 = sshll.u32 %s261_s2, 4  ;;  %s127_s23 = int_to_ptr.hbm [resolvable:$true] %s126_s23 }
   0xd   :  { %v62_v2 = vand.u32 2147483647, %v50_v0  ;;  %v63_v3 = vand.u32 2147483647, %v51_v1  ;;  %v139_v8 = vld [vmem:[#allocation6] sm:$0xff]   ;;  %v56_v18 = vmax.f32 %v50_v0, 0.0 }
   0xe   :  { %v140_v11 = vunpack.c.l.bf16 %v139_v8  ;;  %v141_v14 = vunpack.c.h.bf16 %v139_v8  ;;  %v57_v22 = vmax.f32 %v51_v1, 0.0  ;;  %s233_s26 = smov [#allocation8]  }
   0xf   :  { %v64_v4 = vsub.f32 0.0, %v62_v2  ;;  %v65_v5 = vsub.f32 0.0, %v63_v3 }
  0x10   :  { %v58_v19 = vmul.f32 %v140_v11, %v50_v0  ;;  %v59_v23 = vmul.f32 %v141_v14, %v51_v1  ;;  %vm92_vm0 = vcmp.eq.f32.partialorder %v140_v11, 0.0  ;;  %vm93_vm1 = vcmp.eq.f32.partialorder %v141_v14, 0.0 }
  0x11   :  { %v66_v6 = vmul.f32 1.442695, %v64_v4  ;;  %v68_v7 = vmul.f32 1.442695, %v65_v5  ;;  %vm90_vm2 = vcmp.eq.f32.partialorder %v140_v11, 1.0  ;;  %vm91_vm3 = vcmp.eq.f32.partialorder %v141_v14, 1.0 }
  0x12   :  { %v60_v27 = vsub.f32 %v56_v18, %v58_v19  ;;  %v94_v30 = vsel %vm92_vm0, 1.0, %v232_v29  ;;  %v61_v32 = vsub.f32 %v57_v22, %v59_v23  ;;  %v95_v34 = vsel %vm93_vm1, 1.0, %v232_v29 }
  0x13   :  { %152 = vpow2.f32 %v66_v6  ;;  %v96_v37 = vsel %vm90_vm2, 2.0, %v94_v30  ;;  %v97_v40 = vsel %vm91_vm3, 2.0, %v95_v34 }
  0x14   :  { %154 = vpow2.f32 %v68_v7 }
  0x19   :  { %v153_v9 = vpop.eup %152 }
  0x1a   :  { %v155_v10 = vpop.eup %154  ;;  %v70_v12 = vadd.f32 1.0, %v153_v9  ;;  %v73_v13 = vmul.f32 -0.5, %v153_v9  ;;  %v76_v20 = vand.u32 2147483647, %v153_v9 }
  0x1b   :  { %v79_v15 = vadd.f32 1.0, %v155_v10  ;;  %v82_v16 = vmul.f32 -0.5, %v155_v10  ;;  %v85_v24 = vand.u32 2147483647, %v155_v10 }
  0x1c   :  { %156 = vlog2.f32 %v70_v12  ;;  %v74_v17 = vadd.f32 1.0, %v73_v13  ;;  %vm77_vm4 = vcmp.lt.f32.partialorder %v76_v20, 0.0004427343 }
  0x1d   :  { %158 = vlog2.f32 %v79_v15  ;;  %v83_v21 = vadd.f32 1.0, %v82_v16  ;;  %vm86_vm5 = vcmp.lt.f32.partialorder %v85_v24, 0.0004427343 }
  0x1e   :  { %v75_v25 = vmul.f32 %v153_v9, %v74_v17 }
  0x1f   :  { %v84_v28 = vmul.f32 %v155_v10, %v83_v21 }
  0x22   :  { %v157_v26 = vpop.eup %156 }
  0x23   :  { %v159_v31 = vpop.eup %158  ;;  %v72_v33 = vmul.f32 0.6931472, %v157_v26 }
  0x24   :  { %v81_v35 = vmul.f32 0.6931472, %v159_v31 }
  0x25   :  { %v78_v36 = vsel %vm77_vm4, %v75_v25, %v72_v33 }
  0x26   :  { %v87_v38 = vsel %vm86_vm5, %v84_v28, %v81_v35  ;;  %v88_v39 = vadd.f32 %v78_v36, %v60_v27 }
  0x27   :  { %v89_v41 = vadd.f32 %v87_v38, %v61_v32 }
  0x28   :  { %v99_v42 = vmul.f32 %v96_v37, %v88_v39 }
  0x29   :  { %v100_v43 = vmul.f32 %v97_v40, %v89_v41 }
  0x2b   :  { %v101_v44 = vadd.f32 %v100_v43, %v99_v42 }
  0x2d   :  { %102 = vadd.xlane.f32.xlu0 %v101_v44 }
  0xa0   :  { %v103_v45 = vpop.xlane.xlu0 %102 }
  0xa1   :  { %v104_v46 = vrot.slane %v103_v45, 4 }
  0xa3   :  { %v105_v47 = vadd.f32 %v104_v46, %v103_v45 }
  0xa5   :  { %v106_v48 = vrot.slane %v105_v47, 2 }
  0xa7   :  { %v107_v49 = vadd.f32 %v106_v48, %v105_v47 }
  0xa9   :  { %v108_v50 = vrot.slane %v107_v49, 1 }
  0xab   :  { %v109_v51 = vadd.f32 %v108_v50, %v107_v49 }
  0xad   :  { %142 = vpush %v109_v51 }
  0xde   :  { %s143_s24 = spop %142 }
  0xdf   :  { %s118_s25 = smul.f32 0.125, %s143_s24 }
  0xe1   :  { %120 = sst [smem:[#allocation8]] %s118_s25 }
  0xe2   :  { %129 = dma.smem_to_hbm %s233_s26, 16, %s127_s23, [#allocation5]  }
  0xe3   :  { %224 = dma.done.wait [#allocation5], 16  }
  0xe4   :  { %225 = vsyncadd [#allocation5], 4294967280 }
  0xe5   :  { %134 = sfence }
  0xe6   :  { %135 = vsyncpa [#allocation4], 1 }
  0xe7   :  { %136 = vsyncpa [#allocation7], 1 }
  0xe8   :  { %137 = vsyncpa [#allocation5], 1 }

</bundles_post_ra>
